<compile_context>
chip_gen: v7x
topology: tpu7x:2x2x1
jax: 0.10.0
libtpu: 0.0.40
codegen_flags: <defaults>
</compile_context>

<pallas_src>
import jax
import jax.numpy as jnp
import numpy as np
from jax.experimental import pallas as pl
from jax.experimental.pallas import tpu as pltpu


def _round_up(x, m):
    return (x + m - 1) // m * m


def lau_kernel(q_ref, k_ref, w0q_ref, w0k_ref, w0p_ref, b0_ref,
               w1_ref, b1_ref, w2t_ref, b2_ref, o_ref):
    bb, t_pad, e = k_ref.shape
    h0 = w0k_ref.shape[1]
    rows = bb * t_pad

    k = k_ref[...].reshape(rows, e)                                    # bf16
    q = jnp.broadcast_to(q_ref[...], (bb, t_pad, e)).reshape(rows, e)  # bf16
    qk = q * k                                                         # bf16

    # Per-batch query contribution to layer 0 (q is constant across T):
    #   hq = q @ W0_q' + b0  -> computed once per batch, broadcast across T.
    q2 = q_ref[...].reshape(bb, e)
    hq = jnp.dot(q2, w0q_ref[...],
                 preferred_element_type=jnp.float32) + b0_ref[...]     # (bb, H0)
    hq = jnp.broadcast_to(hq[:, None, :], (bb, t_pad, h0)).reshape(rows, h0)

    # Layer 0 (concat folded into W0_k'/W0_p), f32 accumulation on the MXU.
    h = jnp.dot(k, w0k_ref[...], preferred_element_type=jnp.float32)
    h = h + jnp.dot(qk, w0p_ref[...], preferred_element_type=jnp.float32)
    h = jnp.maximum(h + hq, 0.0)                                       # (rows, H0)

    # Layer 1.
    h = jnp.dot(h.astype(jnp.bfloat16), w1_ref[...],
                preferred_element_type=jnp.float32) + b1_ref[...]
    h = jnp.maximum(h, 0.0)                                            # (rows, H1)

    # Final linear, produced lane-dense: (1,H1) x (rows,H1)^T -> (1, rows).
    out = jax.lax.dot_general(
        w2t_ref[...], h.astype(jnp.bfloat16),
        dimension_numbers=(((1,), (1,)), ((), ())),
        preferred_element_type=jnp.float32)                            # (1, rows)
    o_ref[...] = (out + b2_ref[0]).reshape(1, 1, rows)


def local_activation_unit(query, keys, params, *, block_rows=4096):
    """query: (B, 1, E) f32, keys: (B, T, E) f32 -> (B, T, 1) f32."""
    B, _, E = query.shape
    _, T, _ = keys.shape
    w0, b0, w1, b1, w2, b2 = params
    H0 = w0.shape[1]
    H1 = w1.shape[1]

    # Fold the [q, k, q-k, q*k] concat into layer-0 weights.
    w0q = (w0[:E] + w0[2 * E:3 * E]).astype(jnp.bfloat16)    # (E, H0)
    w0k = (w0[E:2 * E] - w0[2 * E:3 * E]).astype(jnp.bfloat16)
    w0p = w0[3 * E:].astype(jnp.bfloat16)
    w1b = w1.astype(jnp.bfloat16)                            # (H0, H1)
    w2t = w2.reshape(H1, 1).T.astype(jnp.bfloat16)           # (1, H1)
    b0r = b0.reshape(1, H0).astype(jnp.float32)
    b1r = b1.reshape(1, H1).astype(jnp.float32)
    b2s = b2.reshape(-1)[:1].astype(jnp.float32)             # (1,) scalar -> SMEM

    # bf16 inputs: halves q/k HBM+VMEM traffic on this mem-bound kernel.
    qb = query.astype(jnp.bfloat16)                          # (B, 1, E)
    kb = keys.astype(jnp.bfloat16)                           # (B, T, E)

    # Row tiling: bb batches x T_pad rows per grid step (~block_rows rows).
    T_pad = _round_up(T, 8)
    bb = max(1, min(B, block_rows // T_pad))
    B_pad = _round_up(B, bb)
    if T_pad != T:
        kb = jnp.pad(kb, ((0, 0), (0, T_pad - T), (0, 0)))
    if B_pad != B:
        kb = jnp.pad(kb, ((0, B_pad - B), (0, 0), (0, 0)))
        qb = jnp.pad(qb, ((0, B_pad - B), (0, 0), (0, 0)))

    n_tiles = B_pad // bb
    rows = bb * T_pad

    full2 = lambda i: (0, 0)

    out = pl.pallas_call(
        lau_kernel,
        out_shape=jax.ShapeDtypeStruct((n_tiles, 1, rows), jnp.float32),
        grid_spec=pltpu.PrefetchScalarGridSpec(
            num_scalar_prefetch=0,
            grid=(n_tiles,),
            in_specs=[
                pl.BlockSpec((bb, 1, E), lambda i: (i, 0, 0)),       # query
                pl.BlockSpec((bb, T_pad, E), lambda i: (i, 0, 0)),   # keys
                pl.BlockSpec((E, H0), full2),                        # W0_q'
                pl.BlockSpec((E, H0), full2),                        # W0_k'
                pl.BlockSpec((E, H0), full2),                        # W0_p
                pl.BlockSpec((1, H0), full2),                        # b0
                pl.BlockSpec((H0, H1), full2),                       # W1
                pl.BlockSpec((1, H1), full2),                        # b1
                pl.BlockSpec((1, H1), full2),                        # W2^T
                pl.BlockSpec(memory_space=pltpu.MemorySpace.SMEM),   # b2 scalar
            ],
            out_specs=pl.BlockSpec((1, 1, rows), lambda i: (i, 0, 0)),
        ),
        compiler_params=pltpu.CompilerParams(
            dimension_semantics=("parallel",)),
    )(qb, kb, w0q, w0k, w0p, b0r, w1b, b1r, w2t, b2s)

    out = out.reshape(B_pad, T_pad)[:B, :T]
    return out[..., None].astype(jnp.float32)


def init_params(key, embedding_size, hidden_units=(64, 32)):
    """Deterministic synthetic init matching LocalActivationUnit shapes."""
    dims = [4 * embedding_size] + list(hidden_units) + [1]
    params = []
    for i in range(len(dims) - 1):
        key, kw, kb = jax.random.split(key, 3)
        w = jax.random.normal(kw, (dims[i], dims[i + 1]), jnp.float32) * 0.05
        b = jax.random.normal(kb, (1, dims[i + 1]), jnp.float32) * 0.05
        params += [w, b]
    return tuple(params)


def local_activation_unit_ref(query, keys, params):
    w0, b0, w1, b1, w2, b2 = params
    B, _, E = query.shape
    T = keys.shape[1]
    q = jnp.broadcast_to(query, (B, T, E))
    x = jnp.concatenate([q, keys, q - keys, q * keys], axis=-1)
    h = jax.nn.relu(x @ w0 + b0)
    h = jax.nn.relu(h @ w1 + b1)
    return h @ w2 + b2


if __name__ == "__main__":
    B, T, E = 2, 8, 32          # batch, seq length T, embedding_size
    hidden_units = (64, 32)

    key = jax.random.PRNGKey(0)
    kq, kk, kp = jax.random.split(key, 3)
    query = jax.random.normal(kq, (B, 1, E), jnp.float32)
    keys = jax.random.normal(kk, (B, T, E), jnp.float32)
    params = init_params(kp, E, hidden_units)

    out = jax.jit(local_activation_unit)(query, keys, params)
    out = jax.block_until_ready(out)

    ref = local_activation_unit_ref(query, keys, params)
    assert out.shape == (B, T, 1)
    # bf16 matmul inputs (f32 accumulation) -> loosened tolerance vs f32 ref.
    np.testing.assert_allclose(np.asarray(out), np.asarray(ref),
                               rtol=5e-2, atol=1e-2)
    print("KERNEL_OK")
</pallas_src>

<mosaic_0001>
module attributes {stable_mosaic.version = 11 : i64} {
  func.func @lau_kernel(%arg0: i32, %arg1: memref<2x1x32xbf16, #tpu.memory_space<vmem>>, %arg2: memref<2x8x32xbf16, #tpu.memory_space<vmem>>, %arg3: memref<32x64xbf16, #tpu.memory_space<vmem>>, %arg4: memref<32x64xbf16, #tpu.memory_space<vmem>>, %arg5: memref<32x64xbf16, #tpu.memory_space<vmem>>, %arg6: memref<1x64xf32, #tpu.memory_space<vmem>>, %arg7: memref<64x32xbf16, #tpu.memory_space<vmem>>, %arg8: memref<1x32xf32, #tpu.memory_space<vmem>>, %arg9: memref<1x32xbf16, #tpu.memory_space<vmem>>, %arg10: memref<1xf32, #tpu.memory_space<smem>>, %arg11: memref<1x1x16xf32, #tpu.memory_space<vmem>>) attributes {dimension_semantics = [#tpu.dimension_semantics<parallel>], iteration_bounds = array<i64: 1>, scalar_prefetch = 0 : i64, scratch_operands = 0 : i64, tpu.core_type = #tpu.core_type<tc>, window_params = [{transform_indices = @transform_0, window_bounds = array<i64: 2, 1, 32>}, {transform_indices = @transform_1, window_bounds = array<i64: 2, 8, 32>}, {pipeline_mode = #tpu.pipeline_mode<synchronous>, transform_indices = @transform_2, window_bounds = array<i64: 32, 64>}, {pipeline_mode = #tpu.pipeline_mode<synchronous>, transform_indices = @transform_3, window_bounds = array<i64: 32, 64>}, {pipeline_mode = #tpu.pipeline_mode<synchronous>, transform_indices = @transform_4, window_bounds = array<i64: 32, 64>}, {pipeline_mode = #tpu.pipeline_mode<synchronous>, transform_indices = @transform_5, window_bounds = array<i64: 1, 64>}, {pipeline_mode = #tpu.pipeline_mode<synchronous>, transform_indices = @transform_6, window_bounds = array<i64: 64, 32>}, {pipeline_mode = #tpu.pipeline_mode<synchronous>, transform_indices = @transform_7, window_bounds = array<i64: 1, 32>}, {pipeline_mode = #tpu.pipeline_mode<synchronous>, transform_indices = @transform_8, window_bounds = array<i64: 1, 32>}, {transform_indices = @transform_9, window_bounds = array<i64: 1>}, {transform_indices = @transform_10, window_bounds = array<i64: 1, 1, 16>}]} {
    %c0 = arith.constant 0 : index
    %c0_0 = arith.constant 0 : index
    %c0_1 = arith.constant 0 : index
    %0 = vector.load %arg2[%c0, %c0_0, %c0_1] : memref<2x8x32xbf16, #tpu.memory_space<vmem>>, vector<2x8x32xbf16>
    %1 = vector.shape_cast %0 : vector<2x8x32xbf16> to vector<16x32xbf16>
    %c0_2 = arith.constant 0 : index
    %c0_3 = arith.constant 0 : index
    %c0_4 = arith.constant 0 : index
    %2 = vector.load %arg1[%c0_2, %c0_3, %c0_4] : memref<2x1x32xbf16, #tpu.memory_space<vmem>>, vector<2x1x32xbf16>
    %3 = vector.shape_cast %2 : vector<2x1x32xbf16> to vector<2x1x32xbf16>
    %4 = vector.broadcast %3 : vector<2x1x32xbf16> to vector<2x8x32xbf16>
    %5 = vector.shape_cast %4 : vector<2x8x32xbf16> to vector<16x32xbf16>
    %6 = arith.mulf %5, %1 : vector<16x32xbf16>
    %c0_5 = arith.constant 0 : index
    %c0_6 = arith.constant 0 : index
    %c0_7 = arith.constant 0 : index
    %7 = vector.load %arg1[%c0_5, %c0_6, %c0_7] : memref<2x1x32xbf16, #tpu.memory_space<vmem>>, vector<2x1x32xbf16>
    %8 = vector.shape_cast %7 : vector<2x1x32xbf16> to vector<2x32xbf16>
    %c0_8 = arith.constant 0 : index
    %c0_9 = arith.constant 0 : index
    %9 = vector.load %arg3[%c0_8, %c0_9] : memref<32x64xbf16, #tpu.memory_space<vmem>>, vector<32x64xbf16>
    %cst = arith.constant dense<0.000000e+00> : vector<2x64xf32>
    %10 = tpu.matmul %8, %9, %cst {dimension_numbers = #tpu.dot_dimension_numbers<[1], [0], [0], [1], [0, 0, 1, 1], [], []>} : vector<2x32xbf16>, vector<32x64xbf16>, vector<2x64xf32> -> vector<2x64xf32>
    %c0_10 = arith.constant 0 : index
    %c0_11 = arith.constant 0 : index
    %11 = vector.load %arg6[%c0_10, %c0_11] : memref<1x64xf32, #tpu.memory_space<vmem>>, vector<1x64xf32>
    %12 = vector.broadcast %11 : vector<1x64xf32> to vector<2x64xf32>
    %13 = arith.addf %10, %12 : vector<2x64xf32>
    %14 = vector.shape_cast %13 : vector<2x64xf32> to vector<2x1x64xf32>
    %15 = vector.shape_cast %14 : vector<2x1x64xf32> to vector<2x1x64xf32>
    %16 = vector.broadcast %15 : vector<2x1x64xf32> to vector<2x8x64xf32>
    %17 = vector.shape_cast %16 : vector<2x8x64xf32> to vector<16x64xf32>
    %c0_12 = arith.constant 0 : index
    %c0_13 = arith.constant 0 : index
    %18 = vector.load %arg4[%c0_12, %c0_13] : memref<32x64xbf16, #tpu.memory_space<vmem>>, vector<32x64xbf16>
    %cst_14 = arith.constant dense<0.000000e+00> : vector<16x64xf32>
    %19 = tpu.matmul %1, %18, %cst_14 {dimension_numbers = #tpu.dot_dimension_numbers<[1], [0], [0], [1], [0, 0, 1, 1], [], []>} : vector<16x32xbf16>, vector<32x64xbf16>, vector<16x64xf32> -> vector<16x64xf32>
    %c0_15 = arith.constant 0 : index
    %c0_16 = arith.constant 0 : index
    %20 = vector.load %arg5[%c0_15, %c0_16] : memref<32x64xbf16, #tpu.memory_space<vmem>>, vector<32x64xbf16>
    %cst_17 = arith.constant dense<0.000000e+00> : vector<16x64xf32>
    %21 = tpu.matmul %6, %20, %cst_17 {dimension_numbers = #tpu.dot_dimension_numbers<[1], [0], [0], [1], [0, 0, 1, 1], [], []>} : vector<16x32xbf16>, vector<32x64xbf16>, vector<16x64xf32> -> vector<16x64xf32>
    %22 = arith.addf %19, %21 : vector<16x64xf32>
    %23 = arith.addf %22, %17 : vector<16x64xf32>
    %cst_18 = arith.constant 0.000000e+00 : f32
    %24 = vector.broadcast %cst_18 : f32 to vector<16x64xf32>
    %25 = arith.maximumf %23, %24 : vector<16x64xf32>
    %26 = arith.truncf %25 : vector<16x64xf32> to vector<16x64xbf16>
    %c0_19 = arith.constant 0 : index
    %c0_20 = arith.constant 0 : index
    %27 = vector.load %arg7[%c0_19, %c0_20] : memref<64x32xbf16, #tpu.memory_space<vmem>>, vector<64x32xbf16>
    %cst_21 = arith.constant dense<0.000000e+00> : vector<16x32xf32>
    %28 = tpu.matmul %26, %27, %cst_21 {dimension_numbers = #tpu.dot_dimension_numbers<[1], [0], [0], [1], [0, 0, 1, 1], [], []>} : vector<16x64xbf16>, vector<64x32xbf16>, vector<16x32xf32> -> vector<16x32xf32>
    %c0_22 = arith.constant 0 : index
    %c0_23 = arith.constant 0 : index
    %29 = vector.load %arg8[%c0_22, %c0_23] : memref<1x32xf32, #tpu.memory_space<vmem>>, vector<1x32xf32>
    %30 = vector.broadcast %29 : vector<1x32xf32> to vector<16x32xf32>
    %31 = arith.addf %28, %30 : vector<16x32xf32>
    %cst_24 = arith.constant 0.000000e+00 : f32
    %32 = vector.broadcast %cst_24 : f32 to vector<16x32xf32>
    %33 = arith.maximumf %31, %32 : vector<16x32xf32>
    %c0_25 = arith.constant 0 : index
    %c0_26 = arith.constant 0 : index
    %34 = vector.load %arg9[%c0_25, %c0_26] : memref<1x32xbf16, #tpu.memory_space<vmem>>, vector<1x32xbf16>
    %35 = arith.truncf %33 : vector<16x32xf32> to vector<16x32xbf16>
    %cst_27 = arith.constant dense<0.000000e+00> : vector<1x16xf32>
    %36 = tpu.matmul %34, %35, %cst_27 {dimension_numbers = #tpu.dot_dimension_numbers<[1], [1], [0], [0], [0, 0, 1, 0], [], []>} : vector<1x32xbf16>, vector<16x32xbf16>, vector<1x16xf32> -> vector<1x16xf32>
    %c0_28 = arith.constant 0 : index
    %37 = memref.load %arg10[%c0_28] : memref<1xf32, #tpu.memory_space<smem>>
    %38 = vector.broadcast %37 : f32 to vector<1x16xf32>
    %39 = arith.addf %36, %38 : vector<1x16xf32>
    %40 = vector.shape_cast %39 : vector<1x16xf32> to vector<1x1x16xf32>
    %c0_29 = arith.constant 0 : index
    %c0_30 = arith.constant 0 : index
    %c0_31 = arith.constant 0 : index
    %41 = vector.load %arg11[%c0_29, %c0_30, %c0_31] : memref<1x1x16xf32, #tpu.memory_space<vmem>>, vector<1x1x16xf32>
    tpu.vector_store %arg11[%c0_29, %c0_30, %c0_31], %40 {strides = array<i32>} : memref<1x1x16xf32, #tpu.memory_space<vmem>>, vector<1x1x16xf32>,
    return
  }
  func.func @transform_0(%arg0: i32) -> (i32, i32, i32) {
    %c0_i32 = arith.constant 0 : i32
    %c0_i32_0 = arith.constant 0 : i32
    %c0_i32_1 = arith.constant 0 : i32
    return %arg0, %c0_i32, %c0_i32_0 : i32, i32, i32
  }
  func.func @transform_1(%arg0: i32) -> (i32, i32, i32) {
    %c0_i32 = arith.constant 0 : i32
    %c0_i32_0 = arith.constant 0 : i32
    %c0_i32_1 = arith.constant 0 : i32
    return %arg0, %c0_i32, %c0_i32_0 : i32, i32, i32
  }
  func.func @transform_2(%arg0: i32) -> (i32, i32) {
    %c0_i32 = arith.constant 0 : i32
    %c0_i32_0 = arith.constant 0 : i32
    %c0_i32_1 = arith.constant 0 : i32
    return %c0_i32, %c0_i32_0 : i32, i32
  }
  func.func @transform_3(%arg0: i32) -> (i32, i32) {
    %c0_i32 = arith.constant 0 : i32
    %c0_i32_0 = arith.constant 0 : i32
    %c0_i32_1 = arith.constant 0 : i32
    return %c0_i32, %c0_i32_0 : i32, i32
  }
  func.func @transform_4(%arg0: i32) -> (i32, i32) {
    %c0_i32 = arith.constant 0 : i32
    %c0_i32_0 = arith.constant 0 : i32
    %c0_i32_1 = arith.constant 0 : i32
    return %c0_i32, %c0_i32_0 : i32, i32
  }
  func.func @transform_5(%arg0: i32) -> (i32, i32) {
    %c0_i32 = arith.constant 0 : i32
    %c0_i32_0 = arith.constant 0 : i32
    %c0_i32_1 = arith.constant 0 : i32
    return %c0_i32, %c0_i32_0 : i32, i32
  }
  func.func @transform_6(%arg0: i32) -> (i32, i32) {
    %c0_i32 = arith.constant 0 : i32
    %c0_i32_0 = arith.constant 0 : i32
    %c0_i32_1 = arith.constant 0 : i32
    return %c0_i32, %c0_i32_0 : i32, i32
  }
  func.func @transform_7(%arg0: i32) -> (i32, i32) {
    %c0_i32 = arith.constant 0 : i32
    %c0_i32_0 = arith.constant 0 : i32
    %c0_i32_1 = arith.constant 0 : i32
    return %c0_i32, %c0_i32_0 : i32, i32
  }
  func.func @transform_8(%arg0: i32) -> (i32, i32) {
    %c0_i32 = arith.constant 0 : i32
    %c0_i32_0 = arith.constant 0 : i32
    %c0_i32_1 = arith.constant 0 : i32
    return %c0_i32, %c0_i32_0 : i32, i32
  }
  func.func @transform_9(%arg0: i32) -> i32 {
    %c0_i32 = arith.constant 0 : i32
    %c0_i32_0 = arith.constant 0 : i32
    return %c0_i32 : i32
  }
  func.func @transform_10(%arg0: i32) -> (i32, i32, i32) {
    %c0_i32 = arith.constant 0 : i32
    %c0_i32_0 = arith.constant 0 : i32
    %c0_i32_1 = arith.constant 0 : i32
    return %arg0, %c0_i32, %c0_i32_0 : i32, i32, i32
  }
}

</mosaic_0001>

<bundles_post_ra>
// kernel: local_activation_unit.1
= control target key start
LH: loop header
LB: loop body
LE: loop exit
PB: predicated region body
PF: predicated region fallthrough
CT: control target
= control target key end

     0   :  { %v44_v0 = vlaneseq  ;;  %v561_v1 = vmov 0.0   ;;  %v562_v3 = vmov 1966171168   ;;  %vm563_vm0 = vmmov 0   ;;  %s717_s2 = inlined_call_operand.vmem [shape: bf16[32,64], index: 2, kind: input, shape index: {}]   ;;  %s718_s4 = inlined_call_operand.vmem [shape: bf16[32,64], index: 4, kind: input, shape index: {}]   ;;  %s719_s0 = inlined_call_operand.vmem [shape: bf16[2,1,32], index: 0, kind: input, shape index: {}]   ;;  %s720_s3 = inlined_call_operand.vmem [shape: bf16[32,64], index: 3, kind: input, shape index: {}]   ;;  %s721_s1 = inlined_call_operand.vmem [shape: bf16[2,8,32], index: 1, kind: input, shape index: {}]   ;;  %s722_s6 = inlined_call_operand.vmem [shape: bf16[64,32], index: 6, kind: input, shape index: {}]   ;;  %s723_s5 = inlined_call_operand.vmem [shape: f32[1,64], index: 5, kind: input, shape index: {}]   ;;  %s724_s7 = inlined_call_operand.vmem [shape: f32[1,32], index: 7, kind: input, shape index: {}]   ;;  %s725_s8 = inlined_call_operand.vmem [shape: bf16[1,32], index: 8, kind: input, shape index: {}]   ;;  %s726_s9 = inlined_call_operand.<no memory space> [shape: f32[1], index: 9, kind: input, shape index: {}]   ;;  %s727_s10 = inlined_call_operand.vmem [shape: f32[1,1,16], index: 10, kind: output, shape index: {}]  }
   0x1   :  { %505 = vmatprep.subr.bf16.mxu0 %v561_v1  ;;  %v550_v2 = vld [vmem:[%s717_s2] sm:$0xff]   ;;  %513 = vmatprep.subr.bf16.mxu1 %v561_v1  ;;  %v71_v4 = vunpack.c.l.s4 %v562_v3  ;;  %v551_v5 = vld [vmem:[%s717_s2 + $0x8] sm:$0xff]   ;;  %vm101_vm1 = vcmask 1041409   ;;  %vm116_vm2 = vcmask 261120   ;;  %v559_v37 = vld [vmem:[%s722_s6 + $0x10] sm:$0xff]   ;;  %vm367_vm3 = vcmask 523264  }
   0x2   :  { %509 = vmatprep.mubr.msk.bf16.mxu0 %vm563_vm0, %v561_v1  ;;  %v45_v6 = vshrl.u32 %v44_v0, 7  ;;  %517 = vmatprep.mubr.msk.bf16.mxu1 %vm563_vm0, %v561_v1  ;;  %v552_v7 = vld [vmem:[%s718_s4] sm:$0xff]   ;;  %v554_v15 = vld [vmem:[%s718_s4 + $0x8] sm:$0xff]   ;;  %v560_v38 = vld [vmem:[%s722_s6 + $0x18] sm:$0xff]   ;;  %vm464_vm4 = vcmask 122880  }
   0x3   :  { %506 = vmatpush3.bf16.msra.mxu0 %v550_v2  ;;  %v72_v8 = vunpack.c.0.s8 %v71_v4  ;;  %v39_v9 = vld [vmem:[%s719_s0] sm:$0x1]  ;;  %v40_v10 = vld [vmem:[%s719_s0 + $0x1] sm:$0x1]  ;;  %514 = vmatpush3.bf16.msra.mxu1 %v552_v7  ;;  %v38_v19 = vld [vmem:[%s721_s1 + $0x4] sm:$0xf] }
   0x4   :  { %507 = vmatprep.subr.bf16.mxu0 %v561_v1  ;;  %v42_v12 = vpack.i.b16 %v39_v9, %v39_v9  ;;  %v643_v13 = vsub.s32 0, %v45_v6  ;;  %v49_v14 = vpack.i.b16 %v40_v10, %v40_v10  ;;  %515 = vmatprep.subr.bf16.mxu1 %v561_v1  ;;  %v37_v16 = vld [vmem:[%s721_s1] sm:$0xf]  ;;  %v556_v33 = vld [vmem:[%s720_s3 + $0x8] sm:$0xff]  }
   0x5   :  { %v641_v11 = vsub.s32 %v72_v8, %v45_v6  ;;  %v553_v31 = vld [vmem:[%s720_s3] sm:$0xff]   ;;  %v478_v34 = vcombine.low %v37_v16, %v38_v19  ;;  %v558_v36 = vld [vmem:[%s722_s6 + $0x8] sm:$0xff]  }
   0x6   :  { %v47_v20 = vrot.slane %v42_v12, %v643_v13  ;;  %v54_v21 = vrot.slane %v49_v14, %v643_v13  ;;  %v557_v35 = vld [vmem:[%s722_s6] sm:$0xff]   ;;  %v417_v14 = vstv %s726_s9 }
   0x7   :  { %508 = vmatpush3.bf16.msra.mxu0 %v551_v5  ;;  %v76_v17 = vrot.slane %v39_v9, %v641_v11  ;;  %v90_v18 = vrot.slane %v40_v10, %v641_v11  ;;  %516 = vmatpush3.bf16.msra.mxu1 %v554_v15  ;;  %v470_v42 = vld [vmem:[%s723_s5] ss:$0 sm:$0xff] }
   0x8   :  { %521 = vmatprep.subr.bf16.mxu0 %v561_v1  ;;  %v55_v24 = vmul.bf16 %v47_v20, %v37_v16  ;;  %v56_v25 = vmul.bf16 %v54_v21, %v38_v19  ;;  %529 = vmatprep.subr.bf16.mxu1 %v561_v1  ;;  %v482_v2 = vld [vmem:[%s724_s7] ss:$0 sm:$0xff] }
   0x9   :  { %v83_v22 = vrot.slane %v76_v17, %v641_v11  ;;  %v97_v23 = vrot.slane %v90_v18, %v641_v11 }
   0xa   :  { %v474_v28 = vcombine.low %v55_v24, %v56_v25 }
   0xb   :  { %v98_v26 = vunpack.c.l.b16 %v83_v22  ;;  %v99_v27 = vunpack.c.l.b16 %v97_v23 }
   0xc   :  { %518 = vmatmul.mubr.msk.bf16.vlgmr.msra.gmra.mrb[0].mxu1 %vm116_vm2, %v474_v28 }
   0xd   :  { %v100_v29 = vrot.slane %v99_v27, 7  ;;  %537 = vmatprep.mubr.msk.bf16.mxu1 %vm563_vm0, %v561_v1  ;;  %530 = vmatpush3.bf16.msra.mxu1 %v557_v35 }
   0xe   :  { %531 = vmatprep.subr.bf16.mxu1 %v561_v1 }
   0xf   :  { %v102_v30 = vsel %vm101_vm1, %v100_v29, %v98_v26 }
  0x10   :  { %v103_v32 = vpack.c.b16 %v102_v30, %v102_v30 }
  0x11   :  { %532 = vmatpush3.bf16.msra.mxu1 %v558_v36 }
  0x12   :  { %510 = vmatmul.mubr.msk.bf16.vlgmr.msra.gmra.mrb[0].mxu0 %vm116_vm2, %v103_v32  ;;  %533 = vmatprep.subr.bf16.mxu1 %v561_v1 }
  0x13   :  { %522 = vmatpush3.bf16.msra.mxu0 %v553_v31  ;;  %525 = vmatprep.mubr.msk.bf16.mxu0 %vm563_vm0, %v561_v1 }
  0x14   :  { %523 = vmatprep.subr.bf16.mxu0 %v561_v1 }
  0x15   :  { %534 = vmatpush3.bf16.msra.mxu1 %v559_v37 }
  0x16   :  { %535 = vmatprep.subr.bf16.mxu1 %v561_v1 }
  0x17   :  { %524 = vmatpush3.bf16.msra.mxu0 %v556_v33 }
  0x18   :  { %541 = vmatprep.subr.bf16.mxu0 %v561_v1 }
  0x19   :  { %536 = vmatpush3.bf16.msra.mxu1 %v560_v38 }
  0x1a   :  { %526 = vmatmul.mubr.msk.bf16.vlgmr.msra.gmra.mrb[4].mxu0 %vm116_vm2, %v478_v34 }
  0x1b   :  { %543 = vmatprep.mubr.msk.bf16.mxu0 %vm563_vm0, %v561_v1 }
  0xdf   :  { %v255_v39 = vpop.f32.mrb[0].mxu1 }
  0xe0   :  { %v519_v40 = vpop.f32.mrb[1].mxu1 }
  0xe1   :  { %v258_v41 = vpop.f32.mrb[2].mxu1 }
  0xe2   :  { %v520_v43 = vpop.f32.mrb[3].mxu1 }
  0xe5   :  { %v154_v44 = vpop.f32.mrb[0].mxu0 }
  0xe6   :  { %v155_v45 = vadd.f32 %v470_v42, %v154_v44  ;;  %v511_v46 = vpop.f32.mrb[1].mxu0 }
  0xe7   :  { %v157_v47 = vpop.f32.mrb[2].mxu0 }
  0xe8   :  { %v167_v48 = vrot.slane %v155_v45, %v641_v11  ;;  %v512_v49 = vpop.f32.mrb[3].mxu0 }
  0xea   :  { %v168_v50 = vcombine.high %v167_v48, %v167_v48  ;;  %v175_v51 = vrot.slane %v167_v48, %v641_v11 }
  0xec   :  { %v182_v52 = vrot.slane %v168_v50, %v641_v11  ;;  %v186_v54 = vrot.slane %v175_v51, %v643_v13 }
  0xed   :  { %v316_v53 = vpop.f32.mrb[4].mxu0 }
  0xee   :  { %v317_v55 = vadd.f32 %v316_v53, %v255_v39  ;;  %v527_v56 = vpop.f32.mrb[5].mxu0  ;;  %v190_v59 = vrot.slane %v182_v52, %v643_v13  ;;  %v414_v13 = vld [vmem:[%s725_s8] sm:$0x1] }
  0xef   :  { %v319_v57 = vpop.f32.mrb[6].mxu0 }
  0xf0   :  { %v323_v58 = vadd.f32 %v317_v55, %v186_v54  ;;  %v320_v60 = vadd.f32 %v319_v57, %v258_v41  ;;  %v528_v61 = vpop.f32.mrb[7].mxu0 }
  0xf2   :  { %v324_v62 = vadd.f32 %v320_v60, %v190_v59  ;;  %v325_v63 = vmax.f32 %v323_v58, 0.0 }
  0xf4   :  { %v326_v0 = vmax.f32 %v324_v62, 0.0 }
  0xf6   :  { %v327_v1 = vpack.c.bf16 %v326_v0, %v325_v63 }
  0xf8   :  { %538 = vmatmul.mubr.msk.bf16.vlgmr.msra.gmra.mrb[4].mxu1 %vm367_vm3, %v327_v1 }
 0x1cb   :  { %v405_v3 = vpop.f32.mrb[4].mxu1 }
 0x1cc   :  { %v406_v4 = vadd.f32 %v482_v2, %v405_v3  ;;  %v539_v5 = vpop.f32.mrb[5].mxu1 }
 0x1cd   :  { %v408_v6 = vpop.f32.mrb[6].mxu1 }
 0x1ce   :  { %v409_v7 = vadd.f32 %v482_v2, %v408_v6  ;;  %v540_v8 = vpop.f32.mrb[7].mxu1  ;;  %v412_v9 = vmax.f32 %v406_v4, 0.0 }
 0x1d0   :  { %v413_v10 = vmax.f32 %v409_v7, 0.0 }
 0x1d2   :  { %v415_v11 = vpack.c.bf16 %v413_v10, %v412_v9 }
 0x1d4   :  { %v422_v12 = vsel %vm116_vm2, %v415_v11, 0 }
 0x1d5   :  { %542 = vmatpush3.bf16.xpose.msra.mxu0 %v422_v12 }
 0x1dc   :  { %544 = vmatmul.mubr.msk.bf16.vlgmr.msra.gmra.mrb[8].mxu0 %vm116_vm2, %v414_v13 }
 0x2af   :  { %v458_v15 = vpop.f32.mrb[8].mxu0 }
 0x2b0   :  { %v459_v16 = vadd.f32 %v458_v15, %v417_v14  ;;  %v545_v17 = vpop.f32.mrb[9].mxu0 }
 0x2b1   :  { %v461_v18 = vpop.f32.mrb[10].mxu0 }
 0x2b2   :  { %465 = vst.msk [vmem:[%s727_s10] sm:$0x1] %vm464_vm4, %v459_v16  ;;  %v546_v19 = vpop.f32.mrb[11].mxu0 }

</bundles_post_ra>
